<compile_context>
chip_gen: v7x
topology: tpu7x:2x2x1
jax: 0.10.0
libtpu: 0.0.40
codegen_flags: <defaults>
</compile_context>

<pallas_src>
import functools

import jax
import jax.numpy as jnp
import numpy as np
from jax import lax
from jax.experimental import pallas as pl
from jax.experimental.pallas import tpu as pltpu


def _speccutout_kernel(rects_ref, x_ref, o_ref, *, num_masks: int,
                       block_batch: int):
    """One grid step = `block_batch` batch elements.

    rects_ref : SMEM int32[B * num_masks * 4], flattened as
                (rect_x, rect_x_end, rect_y, rect_y_end) per mask per batch.
    x_ref     : VMEM (block_batch, F, T) tile of the input spectrogram.
    o_ref     : VMEM (block_batch, F, T) tile of the output (aliases input).
    """
    b0 = pl.program_id(0) * block_batch
    F, T = x_ref.shape[-2], x_ref.shape[-1]

    # Small, cheap iotas; the only full-(F, T) work per batch row is one
    # broadcast-AND, one compare and one select.
    row = lax.broadcasted_iota(jnp.int32, (F, 1), 0)   # freq index
    col = lax.broadcasted_iota(jnp.int32, (1, T), 1)   # time index

    for j in range(block_batch):                       # static, small unroll
        base = (b0 + j) * (num_masks * 4)

        cut = None
        # 31 masks per int32 bit-chunk (bit 31 avoided for int32 safety).
        for c0 in range(0, num_masks, 31):
            fbits = jnp.zeros((F, 1), jnp.int32)
            tbits = jnp.zeros((1, T), jnp.int32)
            for i in range(c0, min(c0 + 31, num_masks)):
                off = base + i * 4
                rx = rects_ref[off + 0]
                rxe = rects_ref[off + 1]
                ry = rects_ref[off + 2]
                rye = rects_ref[off + 3]
                bit = jnp.int32(1 << (i - c0))
                fbits = fbits | jnp.where((row >= rx) & (row < rxe), bit, 0)
                tbits = tbits | jnp.where((col >= ry) & (col < rye), bit, 0)
            chunk_cut = (fbits & tbits) != 0           # (F, T) — one AND + cmp
            cut = chunk_cut if cut is None else (cut | chunk_cut)

        if cut is None:                                # num_masks == 0
            cut = jnp.zeros((F, T), jnp.bool_)

        xj = x_ref[j]
        o_ref[j] = jnp.where(cut, 0.0, xj).astype(o_ref.dtype)


def _choose_block_batch(B, F, T, itemsize,
                        vmem_budget_bytes=16 * 1024 * 1024):
    """Largest divisor of B whose double-buffered in+out blocks fit the budget
    and which keeps >=2 grid steps (so v7x's 2 TensorCores both get work)."""
    max_block_bytes = vmem_budget_bytes // 4   # 2 bufs x (in + out)
    bb = 1
    for cand in range(1, B + 1):
        if B % cand != 0:
            continue
        if cand * F * T * itemsize > max_block_bytes:
            break
        if B >= 2 and (B // cand) < 2:
            continue
        bb = cand
    return bb


def spec_cutout(x, rects_flat, num_masks: int):
    """x: (B, F, T) float; rects_flat: int32[B*num_masks*4] as
    (rx, rx_end, ry, ry_end) per mask per batch."""
    B, F, T = x.shape
    bb = _choose_block_batch(B, F, T, x.dtype.itemsize)
    kernel = functools.partial(_speccutout_kernel, num_masks=num_masks,
                               block_batch=bb)
    return pl.pallas_call(
        kernel,
        out_shape=jax.ShapeDtypeStruct((B, F, T), x.dtype),
        grid_spec=pltpu.PrefetchScalarGridSpec(
            num_scalar_prefetch=1,                 # rects_flat lands in SMEM
            grid=(B // bb,),
            in_specs=[pl.BlockSpec((bb, F, T), lambda b, rects: (b, 0, 0))],
            out_specs=pl.BlockSpec((bb, F, T), lambda b, rects: (b, 0, 0)),
        ),
        # operand 0 = rects_flat (scalar prefetch), operand 1 = x.
        input_output_aliases={1: 0},
        compiler_params=pltpu.CompilerParams(
            dimension_semantics=("parallel",)),
    )(rects_flat, x)


def make_rects(key, batch, num_masks, F, T, rect_time, rect_freq):
    """Deterministic JAX re-implementation of the module's RNG draws.

    Per (batch, mask): rect_x ~ U[0, F - rect_freq), rect_y ~ U[0, T - rect_time),
    w_x ~ U[0, rect_time), w_y ~ U[0, rect_freq), each floored to int
    (matching int(self._rng.uniform(0, hi))).  The PyTorch code really does
    use rect_time for w_x (freq extent) and rect_freq for w_y — kept as-is.
    End coordinates are precomputed so the kernel does no scalar adds.
    """
    u = jax.random.uniform(key, (batch, num_masks, 4))
    his = jnp.array([F - rect_freq, T - rect_time, rect_time, rect_freq],
                    dtype=jnp.float32)
    draws = jnp.floor(u * his).astype(jnp.int32)        # (B, M, 4): rx, ry, wx, wy
    rx, ry, wx, wy = draws[..., 0], draws[..., 1], draws[..., 2], draws[..., 3]
    rects = jnp.stack([rx, rx + wx, ry, ry + wy], axis=-1)  # (rx, rxe, ry, rye)
    return rects


def _numpy_reference(x, rects):
    x = np.array(x).copy()
    rects = np.array(rects)
    B = x.shape[0]
    for b in range(B):
        for (rx, rxe, ry, rye) in rects[b]:
            x[b, rx:rxe, ry:rye] = 0.0
    return x


if __name__ == "__main__":
    B, F, T = 2, 32, 128
    rect_masks, rect_time, rect_freq = 5, 60, 25

    key = jax.random.PRNGKey(0)
    kx, kr = jax.random.split(key)
    x = jax.random.normal(kx, (B, F, T), dtype=jnp.float32)

    rects = make_rects(kr, B, rect_masks, F, T, rect_time, rect_freq)
    rects_flat = rects.reshape(-1).astype(jnp.int32)    # int32[B * rect_masks * 4]

    out = spec_cutout(x, rects_flat, rect_masks)
    out = jax.block_until_ready(out)

    ref = _numpy_reference(x, rects)
    np.testing.assert_allclose(np.array(out), ref, rtol=0, atol=0)

    print("KERNEL_OK")
</pallas_src>

<mosaic_0001>
module attributes {stable_mosaic.version = 11 : i64} {
  func.func @_speccutout_kernel(%arg0: i32, %arg1: memref<40xi32, #tpu.memory_space<smem>>, %arg2: memref<1x32x128xf32, #tpu.memory_space<vmem>>, %arg3: memref<1x32x128xf32, #tpu.memory_space<vmem>>) attributes {dimension_semantics = [#tpu.dimension_semantics<parallel>], iteration_bounds = array<i64: 2>, scalar_prefetch = 1 : i64, scratch_operands = 0 : i64, tpu.core_type = #tpu.core_type<tc>, window_params = [{transform_indices = @transform_0, window_bounds = array<i64: 1, 32, 128>}, {transform_indices = @transform_1, window_bounds = array<i64: 1, 32, 128>}]} {
    %c1_i32 = arith.constant 1 : i32
    %0 = arith.muli %arg0, %c1_i32 : i32
    %1 = tpu.iota {dimensions = array<i32: 0>} : vector<32x1xi32>
    %2 = tpu.iota {dimensions = array<i32: 1>} : vector<1x128xi32>
    %c0_i32 = arith.constant 0 : i32
    %3 = arith.addi %0, %c0_i32 : i32
    %c20_i32 = arith.constant 20 : i32
    %4 = arith.muli %3, %c20_i32 : i32
    %c0_i32_0 = arith.constant 0 : i32
    %5 = vector.broadcast %c0_i32_0 : i32 to vector<32x1xi32>
    %c0_i32_1 = arith.constant 0 : i32
    %6 = vector.broadcast %c0_i32_1 : i32 to vector<1x128xi32>
    %c0_i32_2 = arith.constant 0 : i32
    %7 = arith.addi %4, %c0_i32_2 : i32
    %c0_i32_3 = arith.constant 0 : i32
    %8 = arith.addi %7, %c0_i32_3 : i32
    %9 = arith.index_cast %8 : i32 to index
    %10 = memref.load %arg1[%9] : memref<40xi32, #tpu.memory_space<smem>>
    %c1_i32_4 = arith.constant 1 : i32
    %11 = arith.addi %7, %c1_i32_4 : i32
    %12 = arith.index_cast %11 : i32 to index
    %13 = memref.load %arg1[%12] : memref<40xi32, #tpu.memory_space<smem>>
    %c2_i32 = arith.constant 2 : i32
    %14 = arith.addi %7, %c2_i32 : i32
    %15 = arith.index_cast %14 : i32 to index
    %16 = memref.load %arg1[%15] : memref<40xi32, #tpu.memory_space<smem>>
    %c3_i32 = arith.constant 3 : i32
    %17 = arith.addi %7, %c3_i32 : i32
    %18 = arith.index_cast %17 : i32 to index
    %19 = memref.load %arg1[%18] : memref<40xi32, #tpu.memory_space<smem>>
    %20 = vector.broadcast %10 : i32 to vector<32x1xi32>
    %21 = arith.cmpi sge, %1, %20 : vector<32x1xi32>
    %22 = vector.broadcast %13 : i32 to vector<32x1xi32>
    %23 = arith.cmpi slt, %1, %22 : vector<32x1xi32>
    %24 = arith.andi %21, %23 : vector<32x1xi1>
    %c1_i32_5 = arith.constant 1 : i32
    %c0_i32_6 = arith.constant 0 : i32
    %25 = vector.broadcast %c1_i32_5 : i32 to vector<32x1xi32>
    %26 = vector.broadcast %c0_i32_6 : i32 to vector<32x1xi32>
    %27 = arith.select %24, %25, %26 : vector<32x1xi1>, vector<32x1xi32>
    %28 = arith.ori %5, %27 : vector<32x1xi32>
    %29 = vector.broadcast %16 : i32 to vector<1x128xi32>
    %30 = arith.cmpi sge, %2, %29 : vector<1x128xi32>
    %31 = vector.broadcast %19 : i32 to vector<1x128xi32>
    %32 = arith.cmpi slt, %2, %31 : vector<1x128xi32>
    %33 = arith.andi %30, %32 : vector<1x128xi1>
    %c1_i32_7 = arith.constant 1 : i32
    %c0_i32_8 = arith.constant 0 : i32
    %34 = vector.broadcast %c1_i32_7 : i32 to vector<1x128xi32>
    %35 = vector.broadcast %c0_i32_8 : i32 to vector<1x128xi32>
    %36 = arith.select %33, %34, %35 : vector<1x128xi1>, vector<1x128xi32>
    %37 = arith.ori %6, %36 : vector<1x128xi32>
    %c4_i32 = arith.constant 4 : i32
    %38 = arith.addi %4, %c4_i32 : i32
    %c0_i32_9 = arith.constant 0 : i32
    %39 = arith.addi %38, %c0_i32_9 : i32
    %40 = arith.index_cast %39 : i32 to index
    %41 = memref.load %arg1[%40] : memref<40xi32, #tpu.memory_space<smem>>
    %c1_i32_10 = arith.constant 1 : i32
    %42 = arith.addi %38, %c1_i32_10 : i32
    %43 = arith.index_cast %42 : i32 to index
    %44 = memref.load %arg1[%43] : memref<40xi32, #tpu.memory_space<smem>>
    %c2_i32_11 = arith.constant 2 : i32
    %45 = arith.addi %38, %c2_i32_11 : i32
    %46 = arith.index_cast %45 : i32 to index
    %47 = memref.load %arg1[%46] : memref<40xi32, #tpu.memory_space<smem>>
    %c3_i32_12 = arith.constant 3 : i32
    %48 = arith.addi %38, %c3_i32_12 : i32
    %49 = arith.index_cast %48 : i32 to index
    %50 = memref.load %arg1[%49] : memref<40xi32, #tpu.memory_space<smem>>
    %51 = vector.broadcast %41 : i32 to vector<32x1xi32>
    %52 = arith.cmpi sge, %1, %51 : vector<32x1xi32>
    %53 = vector.broadcast %44 : i32 to vector<32x1xi32>
    %54 = arith.cmpi slt, %1, %53 : vector<32x1xi32>
    %55 = arith.andi %52, %54 : vector<32x1xi1>
    %c2_i32_13 = arith.constant 2 : i32
    %c0_i32_14 = arith.constant 0 : i32
    %56 = vector.broadcast %c2_i32_13 : i32 to vector<32x1xi32>
    %57 = vector.broadcast %c0_i32_14 : i32 to vector<32x1xi32>
    %58 = arith.select %55, %56, %57 : vector<32x1xi1>, vector<32x1xi32>
    %59 = arith.ori %28, %58 : vector<32x1xi32>
    %60 = vector.broadcast %47 : i32 to vector<1x128xi32>
    %61 = arith.cmpi sge, %2, %60 : vector<1x128xi32>
    %62 = vector.broadcast %50 : i32 to vector<1x128xi32>
    %63 = arith.cmpi slt, %2, %62 : vector<1x128xi32>
    %64 = arith.andi %61, %63 : vector<1x128xi1>
    %c2_i32_15 = arith.constant 2 : i32
    %c0_i32_16 = arith.constant 0 : i32
    %65 = vector.broadcast %c2_i32_15 : i32 to vector<1x128xi32>
    %66 = vector.broadcast %c0_i32_16 : i32 to vector<1x128xi32>
    %67 = arith.select %64, %65, %66 : vector<1x128xi1>, vector<1x128xi32>
    %68 = arith.ori %37, %67 : vector<1x128xi32>
    %c8_i32 = arith.constant 8 : i32
    %69 = arith.addi %4, %c8_i32 : i32
    %c0_i32_17 = arith.constant 0 : i32
    %70 = arith.addi %69, %c0_i32_17 : i32
    %71 = arith.index_cast %70 : i32 to index
    %72 = memref.load %arg1[%71] : memref<40xi32, #tpu.memory_space<smem>>
    %c1_i32_18 = arith.constant 1 : i32
    %73 = arith.addi %69, %c1_i32_18 : i32
    %74 = arith.index_cast %73 : i32 to index
    %75 = memref.load %arg1[%74] : memref<40xi32, #tpu.memory_space<smem>>
    %c2_i32_19 = arith.constant 2 : i32
    %76 = arith.addi %69, %c2_i32_19 : i32
    %77 = arith.index_cast %76 : i32 to index
    %78 = memref.load %arg1[%77] : memref<40xi32, #tpu.memory_space<smem>>
    %c3_i32_20 = arith.constant 3 : i32
    %79 = arith.addi %69, %c3_i32_20 : i32
    %80 = arith.index_cast %79 : i32 to index
    %81 = memref.load %arg1[%80] : memref<40xi32, #tpu.memory_space<smem>>
    %82 = vector.broadcast %72 : i32 to vector<32x1xi32>
    %83 = arith.cmpi sge, %1, %82 : vector<32x1xi32>
    %84 = vector.broadcast %75 : i32 to vector<32x1xi32>
    %85 = arith.cmpi slt, %1, %84 : vector<32x1xi32>
    %86 = arith.andi %83, %85 : vector<32x1xi1>
    %c4_i32_21 = arith.constant 4 : i32
    %c0_i32_22 = arith.constant 0 : i32
    %87 = vector.broadcast %c4_i32_21 : i32 to vector<32x1xi32>
    %88 = vector.broadcast %c0_i32_22 : i32 to vector<32x1xi32>
    %89 = arith.select %86, %87, %88 : vector<32x1xi1>, vector<32x1xi32>
    %90 = arith.ori %59, %89 : vector<32x1xi32>
    %91 = vector.broadcast %78 : i32 to vector<1x128xi32>
    %92 = arith.cmpi sge, %2, %91 : vector<1x128xi32>
    %93 = vector.broadcast %81 : i32 to vector<1x128xi32>
    %94 = arith.cmpi slt, %2, %93 : vector<1x128xi32>
    %95 = arith.andi %92, %94 : vector<1x128xi1>
    %c4_i32_23 = arith.constant 4 : i32
    %c0_i32_24 = arith.constant 0 : i32
    %96 = vector.broadcast %c4_i32_23 : i32 to vector<1x128xi32>
    %97 = vector.broadcast %c0_i32_24 : i32 to vector<1x128xi32>
    %98 = arith.select %95, %96, %97 : vector<1x128xi1>, vector<1x128xi32>
    %99 = arith.ori %68, %98 : vector<1x128xi32>
    %c12_i32 = arith.constant 12 : i32
    %100 = arith.addi %4, %c12_i32 : i32
    %c0_i32_25 = arith.constant 0 : i32
    %101 = arith.addi %100, %c0_i32_25 : i32
    %102 = arith.index_cast %101 : i32 to index
    %103 = memref.load %arg1[%102] : memref<40xi32, #tpu.memory_space<smem>>
    %c1_i32_26 = arith.constant 1 : i32
    %104 = arith.addi %100, %c1_i32_26 : i32
    %105 = arith.index_cast %104 : i32 to index
    %106 = memref.load %arg1[%105] : memref<40xi32, #tpu.memory_space<smem>>
    %c2_i32_27 = arith.constant 2 : i32
    %107 = arith.addi %100, %c2_i32_27 : i32
    %108 = arith.index_cast %107 : i32 to index
    %109 = memref.load %arg1[%108] : memref<40xi32, #tpu.memory_space<smem>>
    %c3_i32_28 = arith.constant 3 : i32
    %110 = arith.addi %100, %c3_i32_28 : i32
    %111 = arith.index_cast %110 : i32 to index
    %112 = memref.load %arg1[%111] : memref<40xi32, #tpu.memory_space<smem>>
    %113 = vector.broadcast %103 : i32 to vector<32x1xi32>
    %114 = arith.cmpi sge, %1, %113 : vector<32x1xi32>
    %115 = vector.broadcast %106 : i32 to vector<32x1xi32>
    %116 = arith.cmpi slt, %1, %115 : vector<32x1xi32>
    %117 = arith.andi %114, %116 : vector<32x1xi1>
    %c8_i32_29 = arith.constant 8 : i32
    %c0_i32_30 = arith.constant 0 : i32
    %118 = vector.broadcast %c8_i32_29 : i32 to vector<32x1xi32>
    %119 = vector.broadcast %c0_i32_30 : i32 to vector<32x1xi32>
    %120 = arith.select %117, %118, %119 : vector<32x1xi1>, vector<32x1xi32>
    %121 = arith.ori %90, %120 : vector<32x1xi32>
    %122 = vector.broadcast %109 : i32 to vector<1x128xi32>
    %123 = arith.cmpi sge, %2, %122 : vector<1x128xi32>
    %124 = vector.broadcast %112 : i32 to vector<1x128xi32>
    %125 = arith.cmpi slt, %2, %124 : vector<1x128xi32>
    %126 = arith.andi %123, %125 : vector<1x128xi1>
    %c8_i32_31 = arith.constant 8 : i32
    %c0_i32_32 = arith.constant 0 : i32
    %127 = vector.broadcast %c8_i32_31 : i32 to vector<1x128xi32>
    %128 = vector.broadcast %c0_i32_32 : i32 to vector<1x128xi32>
    %129 = arith.select %126, %127, %128 : vector<1x128xi1>, vector<1x128xi32>
    %130 = arith.ori %99, %129 : vector<1x128xi32>
    %c16_i32 = arith.constant 16 : i32
    %131 = arith.addi %4, %c16_i32 : i32
    %c0_i32_33 = arith.constant 0 : i32
    %132 = arith.addi %131, %c0_i32_33 : i32
    %133 = arith.index_cast %132 : i32 to index
    %134 = memref.load %arg1[%133] : memref<40xi32, #tpu.memory_space<smem>>
    %c1_i32_34 = arith.constant 1 : i32
    %135 = arith.addi %131, %c1_i32_34 : i32
    %136 = arith.index_cast %135 : i32 to index
    %137 = memref.load %arg1[%136] : memref<40xi32, #tpu.memory_space<smem>>
    %c2_i32_35 = arith.constant 2 : i32
    %138 = arith.addi %131, %c2_i32_35 : i32
    %139 = arith.index_cast %138 : i32 to index
    %140 = memref.load %arg1[%139] : memref<40xi32, #tpu.memory_space<smem>>
    %c3_i32_36 = arith.constant 3 : i32
    %141 = arith.addi %131, %c3_i32_36 : i32
    %142 = arith.index_cast %141 : i32 to index
    %143 = memref.load %arg1[%142] : memref<40xi32, #tpu.memory_space<smem>>
    %144 = vector.broadcast %134 : i32 to vector<32x1xi32>
    %145 = arith.cmpi sge, %1, %144 : vector<32x1xi32>
    %146 = vector.broadcast %137 : i32 to vector<32x1xi32>
    %147 = arith.cmpi slt, %1, %146 : vector<32x1xi32>
    %148 = arith.andi %145, %147 : vector<32x1xi1>
    %c16_i32_37 = arith.constant 16 : i32
    %c0_i32_38 = arith.constant 0 : i32
    %149 = vector.broadcast %c16_i32_37 : i32 to vector<32x1xi32>
    %150 = vector.broadcast %c0_i32_38 : i32 to vector<32x1xi32>
    %151 = arith.select %148, %149, %150 : vector<32x1xi1>, vector<32x1xi32>
    %152 = arith.ori %121, %151 : vector<32x1xi32>
    %153 = vector.broadcast %140 : i32 to vector<1x128xi32>
    %154 = arith.cmpi sge, %2, %153 : vector<1x128xi32>
    %155 = vector.broadcast %143 : i32 to vector<1x128xi32>
    %156 = arith.cmpi slt, %2, %155 : vector<1x128xi32>
    %157 = arith.andi %154, %156 : vector<1x128xi1>
    %c16_i32_39 = arith.constant 16 : i32
    %c0_i32_40 = arith.constant 0 : i32
    %158 = vector.broadcast %c16_i32_39 : i32 to vector<1x128xi32>
    %159 = vector.broadcast %c0_i32_40 : i32 to vector<1x128xi32>
    %160 = arith.select %157, %158, %159 : vector<1x128xi1>, vector<1x128xi32>
    %161 = arith.ori %130, %160 : vector<1x128xi32>
    %162 = vector.broadcast %152 : vector<32x1xi32> to vector<32x128xi32>
    %163 = vector.broadcast %161 : vector<1x128xi32> to vector<32x128xi32>
    %164 = arith.andi %162, %163 : vector<32x128xi32>
    %c0_i32_41 = arith.constant 0 : i32
    %165 = vector.broadcast %c0_i32_41 : i32 to vector<32x128xi32>
    %166 = arith.cmpi ne, %164, %165 : vector<32x128xi32>
    %c0 = arith.constant 0 : index
    %c0_42 = arith.constant 0 : index
    %c0_43 = arith.constant 0 : index
    %167 = vector.load %arg2[%c0, %c0_42, %c0_43] : memref<1x32x128xf32, #tpu.memory_space<vmem>>, vector<1x32x128xf32>
    %168 = vector.shape_cast %167 : vector<1x32x128xf32> to vector<32x128xf32>
    %cst = arith.constant 0.000000e+00 : f32
    %169 = vector.broadcast %cst : f32 to vector<32x128xf32>
    %170 = arith.select %166, %169, %168 : vector<32x128xi1>, vector<32x128xf32>
    %c0_44 = arith.constant 0 : index
    %c0_45 = arith.constant 0 : index
    %c0_46 = arith.constant 0 : index
    %171 = vector.load %arg3[%c0_44, %c0_45, %c0_46] : memref<1x32x128xf32, #tpu.memory_space<vmem>>, vector<1x32x128xf32>
    %172 = vector.shape_cast %171 : vector<1x32x128xf32> to vector<32x128xf32>
    %173 = vector.shape_cast %170 : vector<32x128xf32> to vector<1x32x128xf32>
    tpu.vector_store %arg3[%c0_44, %c0_45, %c0_46], %173 {strides = array<i32>} : memref<1x32x128xf32, #tpu.memory_space<vmem>>, vector<1x32x128xf32>,
    return
  }
  func.func @transform_0(%arg0: i32, %arg1: memref<40xi32, #tpu.memory_space<smem>>) -> (i32, i32, i32) {
    %c0_i32 = arith.constant 0 : i32
    %c0_i32_0 = arith.constant 0 : i32
    %c0_i32_1 = arith.constant 0 : i32
    return %arg0, %c0_i32, %c0_i32_0 : i32, i32, i32
  }
  func.func @transform_1(%arg0: i32, %arg1: memref<40xi32, #tpu.memory_space<smem>>) -> (i32, i32, i32) {
    %c0_i32 = arith.constant 0 : i32
    %c0_i32_0 = arith.constant 0 : i32
    %c0_i32_1 = arith.constant 0 : i32
    return %arg0, %c0_i32, %c0_i32_0 : i32, i32, i32
  }
}

</mosaic_0001>

<bundles_post_ra>
// kernel: tpu_custom_call.1
= control target key start
LH: loop header
LB: loop body
LE: loop exit
PB: predicated region body
PF: predicated region fallthrough
CT: control target
= control target key end

     0   :  { %s1105_s0 = inlined_call_operand.vmem [shape: s32[40], index: 0, kind: input, shape index: {}]   ;;  %s1106_s1 = inlined_call_operand.hbm [shape: f32[2,32,128], index: 1, kind: input, shape index: {}, may-alias: {1,2}]   ;;  %s1107_s2 = inlined_call_operand.hbm [shape: f32[2,32,128], index: 2, kind: output, shape index: {}, may-alias: {1,2}]  }
   0x1   :  { %s7_s11 = sshll.u32 %s1105_s0, 4  ;;  %s8_s11 = int_to_ptr.vmem [resolvable:$true] %s7_s11 }
   0x2   :  { %s504_s12 = scalar_lea.vmem %s8_s11, 16  ;;  %p509_p1 = scmp.lt.s32.totalorder %s8_s11, %s8_s11 }
   0x3   :  { %p505_p0 = scmp.ne.s32.totalorder %s8_s11, %s504_s12  ;;  %p510_p2 = scmp.lt.s32.totalorder %s504_s12, %s504_s12 }
   0x5   :  { %p511_p3 = por %p510_p2, %p509_p1 }
   0x7   :  { %p512_p4 = pnand %p511_p3, %p505_p0 }
   0x9   :  { %515 = shalt.err (!%p512_p4)  }
   0xa   :  { %s616_s13 = smov [#allocation3]  }
   0xb   :  { %10 = dma.vmem_to_smem %s8_s11, 16, %s616_s13, [#allocation2] }
   0xc   :  { %590 = dma.done.wait [#allocation2], 16 }
   0xd   :  { %591 = vsyncadd [#allocation2], 4294967280 }
   0xe   :  { %12 = sfence }
   0xf   :  { %13 = vsyncpa [#allocation5], 0 }
  0x10   :  { %15 = vsyncpa [#allocation5 + $0x1], 0 }
  0x11   :  { %16 = vsyncpa [#allocation6], 0 }
  0x12   :  { %18 = vsyncpa [#allocation6 + $0x1], 0  ;;  %s642_s14 = smov 0   ;;  %s644_s0 = smov 0  }
  0x13   :  { %s646_s15 = smov 0   ;;  %s648_s16 = smov 0  }
  0x14 LB: > { %s663_s17 = sadd.s32 4294967295, %s614_s16   ;;  %s436_s18 = sadd.s32 4294967294, %s614_s16   ;;  %s614_s16 = sphi %s648_s16, %s1130_s16   ;;  %s610_s15 = sphi %s646_s15, %s1129_s15   ;;  %s606_s0 = sphi %s644_s0, %s1128_s0   ;;  %s602_s14 = sphi %s642_s14, %s1127_s14  }
  0x15   : > { %s667_s19 = sadd.s32 1, %s614_s16   ;;  %s31_s20 = sadd.s32 1, %s610_s15 }
  0x16   : > { %s28_s21 = ssub.s32 %s614_s16, %s667_s19  ;;  %p38_p5 = scmp.ne.s32.totalorder %s610_s15, %s606_s0 }
  0x17   : > { %p29_p6 = scmp.eq.s32.totalorder %s28_s21, 0  ;;  %p39_p7 = scmp.eq.s32.totalorder %s614_s16, 0 }
  0x18   : > { %p44_p8 = scmp.ne.s32.totalorder %s606_s0, %s602_s14  ;;  %p45_p9 = scmp.eq.s32.totalorder %s663_s17, 0 }
  0x19   : > { %s679_s22 = scalar_select %p29_p6, %s610_s15, %s31_s20  }
  0x1a   : > { %p681_p10 = por %p39_p7, %p38_p5  ;;  %p685_p11 = por %p45_p9, %p44_p8 }
  0x1b   : > { %p68_p12 = scmp.eq.s32.totalorder %s663_s17, 1  ;;  %p74_p13 = scmp.eq.s32.totalorder %s436_s18, 1 }
  0x1c   : > { %p464_p1 = scmp.lt.s32.totalorder %s614_s16, 2  ;;  %s94_s27 = sand.u32 1, %s610_s15  }
  0x1d   : > { %p692_p2 = por %p68_p12, %p38_p5  ;;  %p696_p3 = por %p74_p13, %p44_p8 }
  0x1e   : > { %s450_s28 = sshll.u32 %s614_s16, 9  ;;  %s439_s29 = sshll.u32 %s94_s27, 5 }
  0x1f   : > { %s1111_s25 = scalar_select %p692_p2, 1, 0 }
  0x20   : > { %s1112_s26 = scalar_select %p696_p3, 1, 0 }
  0x21   : > { %s705_s4 = scalar_lea.hbm %s1106_s1, %s450_s28  ;;  %s98_s5 = scalar_lea.vmem [#allocation4], %s439_s29 }
  0x22   : > { %s105_s6 = sshll.u32 %s98_s5, 4  ;;  %p709_p4 = pnand %p464_p1, %p681_p10  ;;  %s713_s6 = int_to_ptr.vmem [resolvable:$true] %s105_s6 }
  0x23   : > { %s715_s8 = scalar_lea.sflag [#allocation5], %s94_s27  ;;  %s516_s9 = scalar_lea.hbm %s705_s4, 512 }
  0x24   : > { %p517_p5 = scmp.ne.s32.totalorder %s705_s4, %s516_s9  ;;  %p518_p6 = pneg %p709_p4 }
  0x25   : > { %s521_s12 = scalar_lea.hbm %s1106_s1, 1024  ;;  %p522_p9 = scmp.lt.u32.totalorder %s705_s4, %s1106_s1 }
  0x26   : > { %p519_p7 = pnand %p518_p6, %p517_p5  ;;  %p523_p10 = scmp.lt.u32.totalorder %s521_s12, %s516_s9 }
  0x27   : > { %p525_p13 = scmp.lt.u32.totalorder %s516_s9, %s705_s4 }
  0x28   : > { %p520_p8 = pneg %p519_p7  ;;  %p524_p12 = por %p523_p10, %p522_p9 }
  0x2a   : > { %p526_p1 = por %p525_p13, %p524_p12 }
  0x2c   : > { %p527_p0 = pnand %p526_p1, %p520_p8 }
  0x2e   : > { %530 = shalt.err (!%p527_p0)
}
  0x2f   : > { %s531_s20 = scalar_lea.vmem %s713_s6, 512  ;;  %s617_s21 = smov [#allocation4]  }
  0x30   : > { %p532_p5 = scmp.ne.s32.totalorder %s713_s6, %s531_s20  ;;  %s536_s23 = sshll.u32 %s617_s21, 4  ;;  %s537_s23 = int_to_ptr.vmem [resolvable:$false] %s536_s23 }
  0x31   : > { %s538_s27 = scalar_lea.vmem %s537_s23, 1024  ;;  %p539_p2 = scmp.lt.s32.totalorder %s713_s6, %s537_s23 }
  0x32   : > { %p534_p7 = pnand %p532_p5, %p518_p6  ;;  %p540_p9 = scmp.lt.s32.totalorder %s538_s27, %s531_s20 }
  0x34   : > { %p535_p3 = pneg %p534_p7  ;;  %p541_p10 = por %p540_p9, %p539_p2 }
  0x36   : > { %p542_p12 = pnand %p541_p10, %p535_p3 }
  0x38   : > { %545 = shalt.err (!%p542_p12)
}
  0x39   : > { %s618_s28 = smov 128   ;;  %s619_s29 = smov 8  }
  0x3a   : > { %459 = dma.hbm_to_vmem [thread:$0]  (!%p709_p4), %s705_s4, 512, %s713_s6, %s715_s8, %s618_s28, %s618_s28, %s619_s29  }
  0x3b   : > { %p442_p0 = scmp.ge.s32.totalorder %s614_s16, 1  ;;  %p113_p6 = scmp.lt.s32.totalorder %s614_s16, 3 }
  0x3d   : > { %p114_p8 = pnand %p442_p0, %p113_p6 }
  0x3e   : > { %s746_s30 = sand.u32 (!%p114_p8), 1, %s606_s0  }
  0x3f   : > { %117 = sbr.rel (%p114_p8) target bundleno = 135 (0x87), region = 24  ;;  %s443_s3 = sshll.u32 (!%p114_p8), %s746_s30, 5 }
  0x40   : > { %s120_s5 = scalar_lea.sflag (!%p114_p8), [#allocation5], %s746_s30  ;;  %s752_s9 = scalar_lea.vmem (!%p114_p8), [#allocation4], %s443_s3 }
  0x46   : > { %593 = dma.done.wait (%p685_p11), %s120_s5, 512  }
  0x47   : > { %595 = vsyncadd (%p685_p11), %s120_s5, 4294966784  ;;  %v142_v0 = vlaneseq  ;;  %s759_s4 = smul.u32 20, %s663_s17  ;;  %v620_v10 = vmov 0   ;;  %p1124_p2 = scmp.ne.s32.totalorder %s1111_s25, 0 }
  0x49   : > { %v761_v1 = vshrl.u32 %v142_v0, 7  ;;  %s150_s6 = sld [smem:[#allocation3 + %s759_s4]]  ;;  %s151_s7 = sadd.s32 1, %s759_s4  ;;  %v774_v3 = vand.u32 127, %v142_v0 }
  0x4a   : > { %s152_s8 = sld [smem:[#allocation3 + %s151_s7]]  ;;  %s153_s10 = sadd.s32 2, %s759_s4 }
  0x4b   : > { %s154_s24 = sld [smem:[#allocation3 + %s153_s10]]  ;;  %s155_s11 = sadd.s32 3, %s759_s4  ;;  %v771_v2 = vadd.s32 8, %v761_v1  ;;  %v780_v4 = vadd.s32 16, %v761_v1  ;;  %v829_v13 = vadd.s32 24, %v761_v1 }
  0x4c   : > { %s767_s12 = sld [smem:[#allocation3 + %s155_s11]]  ;;  %s181_s13 = sadd.s32 4, %s759_s4 }
  0x4d   : > { %s182_s18 = sld [smem:[#allocation3 + %s181_s13]]  ;;  %s183_s20 = sadd.s32 5, %s759_s4 }
  0x4e   : > { %s776_s21 = sld [smem:[#allocation3 + %s183_s20]]  ;;  %s185_s23 = sadd.s32 6, %s759_s4 }
  0x4f   : > { %v782_v5 = vstv %s150_s6  ;;  %s784_s27 = sld [smem:[#allocation3 + %s185_s23]]  ;;  %s187_s28 = sadd.s32 7, %s759_s4 }
  0x50   : > { %vm158_vm0 = vcmp.ge.s32.totalorder %v761_v1, %v782_v5  ;;  %v789_v6 = vstv %s152_s8  ;;  %s791_s29 = sld [smem:[#allocation3 + %s187_s28]]  ;;  %s218_s5 = sadd.s32 8, %s759_s4  ;;  %vm159_vm1 = vcmp.ge.s32.totalorder %v771_v2, %v782_v5  ;;  %vm160_vm6 = vcmp.ge.s32.totalorder %v780_v4, %v782_v5 }
  0x51   : > { %vm163_vm2 = vcmp.lt.s32.totalorder %v761_v1, %v789_v6  ;;  %v175_v7 = vstv %s154_s24  ;;  %s798_s6 = sld [smem:[#allocation3 + %s218_s5]]  ;;  %s220_s7 = sadd.s32 9, %s759_s4  ;;  %vm164_vm3 = vcmp.lt.s32.totalorder %v771_v2, %v789_v6  ;;  %vm165_vm7 = vcmp.lt.s32.totalorder %v780_v4, %v789_v6 }
  0x52   : > { %vm167_vm4 = vmand %vm158_vm0, %vm163_vm2  ;;  %vm804_vm5 = vcmp.ge.s32.totalorder %v774_v3, %v175_v7  ;;  %v177_v9 = vstv %s767_s12  ;;  %s809_s8 = sld [smem:[#allocation3 + %s220_s7]]  ;;  %s222_s10 = sadd.s32 10, %s759_s4 }
  0x53   : > { %v817_v11 = vsel %vm167_vm4, 1, %v620_v10  ;;  %vm178_vm8 = vcmp.lt.s32.totalorder %v774_v3, %v177_v9  ;;  %v820_v12 = vstv %s182_s18  ;;  %s822_s24 = sld [smem:[#allocation3 + %s222_s10]]  ;;  %s224_s11 = sadd.s32 11, %s759_s4  ;;  %vm168_vm9 = vmand %vm159_vm1, %vm164_vm3 }
  0x54   : > { %vm179_vm10 = vmand %vm804_vm5, %vm178_vm8  ;;  %vm190_vm11 = vcmp.ge.s32.totalorder %v761_v1, %v820_v12  ;;  %v836_v14 = vstv %s776_s21  ;;  %s838_s12 = sld [smem:[#allocation3 + %s224_s11]]  ;;  %s255_s13 = sadd.s32 12, %s759_s4  ;;  %v842_v15 = vsel %vm168_vm9, 1, %v620_v10  ;;  %vm191_vm12 = vcmp.ge.s32.totalorder %v771_v2, %v820_v12 }
  0x55   : > { %v180_v16 = vsel %vm179_vm10, 1, %v620_v10  ;;  %vm195_vm13 = vcmp.lt.s32.totalorder %v761_v1, %v836_v14  ;;  %v211_v17 = vstv %s784_s27  ;;  %s850_s18 = sld [smem:[#allocation3 + %s255_s13]]  ;;  %s257_s20 = sadd.s32 13, %s759_s4  ;;  %vm196_vm14 = vcmp.lt.s32.totalorder %v771_v2, %v836_v14  ;;  %vm169_vm15 = vmand %vm160_vm6, %vm165_vm7 }
  0x56   : > { %vm199_vm0 = vmand %vm190_vm11, %vm195_vm13  ;;  %vm862_vm1 = vcmp.ge.s32.totalorder %v774_v3, %v211_v17  ;;  %v213_v19 = vstv %s791_s29  ;;  %s867_s21 = sld [smem:[#allocation3 + %s257_s20]]  ;;  %s259_s23 = sadd.s32 14, %s759_s4  ;;  %v871_v20 = vsel %vm169_vm15, 1, %v620_v10  ;;  %vm192_vm2 = vcmp.ge.s32.totalorder %v780_v4, %v820_v12 }
  0x57   : > { %v203_v21 = vsel %vm199_vm0, 2, %v620_v10  ;;  %vm877_vm3 = vcmp.lt.s32.totalorder %v774_v3, %v213_v19  ;;  %v882_v23 = vstv %s798_s6  ;;  %s884_s27 = sld [smem:[#allocation3 + %s259_s23]]  ;;  %s261_s28 = sadd.s32 15, %s759_s4  ;;  %vm200_vm4 = vmand %vm191_vm12, %vm196_vm14  ;;  %vm197_vm5 = vcmp.lt.s32.totalorder %v780_v4, %v836_v14  ;;  %v339_v19 = vld [vmem:[%s752_s9 + $0x10] sm:$0xff] }
  0x58   : > { %v207_v24 = vor.u32 %v203_v21, %v817_v11  ;;  %vm215_vm6 = vmand %vm862_vm1, %vm877_vm3  ;;  %vm227_vm7 = vcmp.ge.s32.totalorder %v761_v1, %v882_v23  ;;  %v900_v25 = vstv %s809_s8  ;;  %s902_s29 = sld [smem:[#allocation3 + %s261_s28]]  ;;  %s292_s5 = sadd.s32 16, %s759_s4  ;;  %v204_v26 = vsel %vm200_vm4, 2, %v620_v10 }
  0x59   : > { %vm161_vm8 = vcmp.ge.s32.totalorder %v829_v13, %v782_v5  ;;  %vm166_vm9 = vcmp.lt.s32.totalorder %v829_v13, %v789_v6  ;;  %v216_v27 = vsel %vm215_vm6, 2, %v620_v10  ;;  %vm232_vm10 = vcmp.lt.s32.totalorder %v761_v1, %v900_v25  ;;  %s914_s6 = sld [smem:[#allocation3 + %s292_s5]]  ;;  %s294_s7 = sadd.s32 17, %s759_s4  ;;  %vm945_vm0 = vmand %vm192_vm2, %vm197_vm5  ;;  %v338_v6 = vld [vmem:[%s752_s9 + $0x8] sm:$0xff] }
  0x5a   : > { %v248_v28 = vstv %s822_s24  ;;  %v208_v29 = vor.u32 %v204_v26, %v842_v15  ;;  %v217_v30 = vor.u32 %v216_v27, %v180_v16  ;;  %vm236_vm11 = vmand %vm227_vm7, %vm232_vm10  ;;  %v250_v32 = vstv %s838_s12  ;;  %s924_s8 = sld [smem:[#allocation3 + %s294_s7]]  ;;  %s296_s10 = sadd.s32 18, %s759_s4 }
  0x5b   : > { %vm919_vm12 = vcmp.ge.s32.totalorder %v774_v3, %v248_v28  ;;  %vm228_vm13 = vcmp.ge.s32.totalorder %v771_v2, %v882_v23  ;;  %v240_v33 = vsel %vm236_vm11, 4, %v620_v10  ;;  %vm251_vm14 = vcmp.lt.s32.totalorder %v774_v3, %v250_v32  ;;  %s934_s24 = sld [smem:[#allocation3 + %s296_s10]]  ;;  %s298_s11 = sadd.s32 19, %s759_s4 }
  0x5c   : > { %v932_v34 = vstv %s850_s18  ;;  %vm233_vm15 = vcmp.lt.s32.totalorder %v771_v2, %v900_v25  ;;  %v244_v36 = vor.u32 %v240_v33, %v207_v24  ;;  %vm252_vm1 = vmand %vm919_vm12, %vm251_vm14  ;;  %v954_v37 = vstv %s867_s21  ;;  %s956_s4 = sld [smem:[#allocation3 + %s298_s11]]  ;;  %s141_s12 = scalar_lea.vmem [#allocation7], %s443_s3 }
  0x5d   : > { %vm264_vm3 = vcmp.ge.s32.totalorder %v761_v1, %v932_v34  ;;  %vm265_vm4 = vcmp.ge.s32.totalorder %v771_v2, %v932_v34  ;;  %v253_v38 = vsel %vm252_vm1, 4, %v620_v10  ;;  %vm269_vm2 = vcmp.lt.s32.totalorder %v761_v1, %v954_v37  ;;  %vm237_vm5 = vmand %vm228_vm13, %vm233_vm15  ;;  %s363_s3 = sshll.u32 %s141_s12, 4  ;;  %s451_s13 = sshll.u32 %s663_s17, 9  ;;  %s1056_s3 = int_to_ptr.vmem [resolvable:$true] %s363_s3 }
  0x5e   : > { %v285_v39 = vstv %s884_s27  ;;  %vm270_vm6 = vcmp.lt.s32.totalorder %v771_v2, %v954_v37  ;;  %v254_v40 = vor.u32 %v253_v38, %v217_v30  ;;  %vm273_vm7 = vmand %vm264_vm3, %vm269_vm2  ;;  %v287_v41 = vstv %s902_s29  ;;  %s1061_s21 = scalar_lea.hbm %s1107_s2, %s451_s13  ;;  %s350_s23 = scalar_lea.sflag [#allocation6], %s746_s30 }
  0x5f   : > { %vm286_vm10 = vcmp.ge.s32.totalorder %v774_v3, %v285_v39  ;;  %v241_v42 = vsel %vm237_vm5, 4, %v620_v10  ;;  %v277_v43 = vsel %vm273_vm7, 8, %v620_v10  ;;  %vm288_vm11 = vcmp.lt.s32.totalorder %v774_v3, %v287_v41  ;;  %vm274_vm12 = vmand %vm265_vm4, %vm270_vm6  ;;  %s546_s27 = scalar_lea.vmem %s1056_s3, 512  ;;  %s621_s17 = smov [#allocation7]  }
  0x60   : > { %v975_v44 = vstv %s914_s6  ;;  %v245_v45 = vor.u32 %v241_v42, %v208_v29  ;;  %v281_v46 = vor.u32 %v277_v43, %v244_v36  ;;  %vm289_vm13 = vmand %vm286_vm10, %vm288_vm11  ;;  %v983_v47 = vstv %s924_s8  ;;  %p547_p11 = scmp.ne.s32.totalorder %s1056_s3, %s546_s27 }
  0x61   : > { %vm301_vm14 = vcmp.ge.s32.totalorder %v761_v1, %v975_v44  ;;  %v278_v48 = vsel %vm274_vm12, 8, %v620_v10  ;;  %v290_v49 = vsel %vm289_vm13, 8, %v620_v10  ;;  %vm306_vm15 = vcmp.lt.s32.totalorder %v761_v1, %v983_v47  ;;  %vm170_vm6 = vmand %vm161_vm8, %vm166_vm9  ;;  %v337_v1 = vld [vmem:[%s752_s9] sm:$0xff] }
  0x62   : > { %v322_v50 = vstv %s934_s24  ;;  %v282_v51 = vor.u32 %v278_v48, %v245_v45  ;;  %v291_v52 = vor.u32 %v290_v49, %v254_v40  ;;  %vm310_vm1 = vmand %vm301_vm14, %vm306_vm15  ;;  %v324_v53 = vstv %s956_s4  ;;  %p548_p3 = pnand %p547_p11, %p1124_p2 }
  0x63   : > { %vm323_vm3 = vcmp.ge.s32.totalorder %v774_v3, %v322_v50  ;;  %vm302_vm4 = vcmp.ge.s32.totalorder %v771_v2, %v975_v44  ;;  %v314_v54 = vsel %vm310_vm1, 16, %v620_v10  ;;  %vm325_vm2 = vcmp.lt.s32.totalorder %v774_v3, %v324_v53 }
  0x64   : > { %vm307_vm5 = vcmp.lt.s32.totalorder %v771_v2, %v983_v47  ;;  %v205_v55 = vsel %vm945_vm0, 2, %v620_v10  ;;  %v318_v56 = vor.u32 %v314_v54, %v281_v46  ;;  %vm326_vm7 = vmand %vm323_vm3, %vm325_vm2  ;;  %vm229_vm10 = vcmp.ge.s32.totalorder %v780_v4, %v882_v23  ;;  %p549_p4 = pneg %p548_p3 }
  0x65   : > { %v209_v57 = vor.u32 %v205_v55, %v871_v20  ;;  %vm234_vm11 = vcmp.lt.s32.totalorder %v780_v4, %v900_v25  ;;  %v327_v58 = vsel %vm326_vm7, 16, %v620_v10  ;;  %vm311_vm0 = vmand %vm302_vm4, %vm307_vm5  ;;  %vm266_vm12 = vcmp.ge.s32.totalorder %v780_v4, %v932_v34 }
  0x66   : > { %vm271_vm8 = vcmp.lt.s32.totalorder %v780_v4, %v954_v37  ;;  %vm303_vm9 = vcmp.ge.s32.totalorder %v780_v4, %v975_v44  ;;  %v328_v59 = vor.u32 %v327_v58, %v291_v52  ;;  %v315_v60 = vsel %vm311_vm0, 16, %v620_v10  ;;  %vm238_vm13 = vmand %vm229_vm10, %vm234_vm11 }
  0x67   : > { %vm308_vm14 = vcmp.lt.s32.totalorder %v780_v4, %v983_v47  ;;  %v174_v61 = vsel %vm170_vm6, 1, %v620_v10  ;;  %v319_v62 = vor.u32 %v315_v60, %v282_v51  ;;  %v242_v63 = vsel %vm238_vm13, 4, %v620_v10  ;;  %vm275_vm15 = vmand %vm266_vm12, %vm271_vm8 }
  0x68   : > { %vm193_vm1 = vcmp.ge.s32.totalorder %v829_v13, %v820_v12  ;;  %vm198_vm3 = vcmp.lt.s32.totalorder %v829_v13, %v836_v14  ;;  %v329_v0 = vand.u32 %v328_v59, %v318_v56  ;;  %v246_v2 = vor.u32 %v242_v63, %v209_v57  ;;  %vm312_vm4 = vmand %vm303_vm9, %vm308_vm14 }
  0x69   : > { %v279_v3 = vsel %vm275_vm15, 8, %v620_v10  ;;  %vm230_vm2 = vcmp.ge.s32.totalorder %v829_v13, %v882_v23  ;;  %v330_v5 = vand.u32 %v328_v59, %v319_v62  ;;  %v316_v7 = vsel %vm312_vm4, 16, %v620_v10  ;;  %vm202_vm5 = vmand %vm193_vm1, %vm198_vm3 }
  0x6a   : > { %vm235_vm6 = vcmp.lt.s32.totalorder %v829_v13, %v900_v25  ;;  %vm267_vm7 = vcmp.ge.s32.totalorder %v829_v13, %v932_v34  ;;  %vm333_vm10 = vcmp.ne.s32.totalorder %v329_v0, 0  ;;  %v283_v8 = vor.u32 %v279_v3, %v246_v2  ;;  %v340_v25 = vld [vmem:[%s752_s9 + $0x18] sm:$0xff]  ;;  %s550_s9 = sshll.u32 %s621_s17, 4  ;;  %s551_s9 = int_to_ptr.vmem [resolvable:$false] %s550_s9 }
  0x6b   : > { %v206_v4 = vsel %vm202_vm5, 2, %v620_v10  ;;  %vm239_vm11 = vmand %vm230_vm2, %vm235_vm6  ;;  %vm272_vm0 = vcmp.lt.s32.totalorder %v829_v13, %v954_v37  ;;  %v341_v9 = vsel %vm333_vm10, 0.0, %v337_v1  ;;  %vm334_vm12 = vcmp.ne.s32.totalorder %v330_v5, 0  ;;  %s552_s28 = scalar_lea.vmem %s551_s9, 1024  ;;  %p553_p13 = scmp.lt.s32.totalorder %s1056_s3, %s551_s9 }
  0x6c   : > { %v210_v11 = vor.u32 %v206_v4, %v174_v61  ;;  %v243_v12 = vsel %vm239_vm11, 4, %v620_v10  ;;  %vm276_vm8 = vmand %vm267_vm7, %vm272_vm0  ;;  %345 = vst [vmem:[%s141_s12] sm:$0xff] %v341_v9  ;;  %v342_v14 = vsel %vm334_vm12, 0.0, %v338_v6  ;;  %v320_v15 = vor.u32 %v316_v7, %v283_v8  ;;  %p554_p1 = scmp.lt.s32.totalorder %s552_s28, %s546_s27 }
  0x6d   : > { %v280_v16 = vsel %vm276_vm8, 8, %v620_v10  ;;  %vm304_vm9 = vcmp.ge.s32.totalorder %v829_v13, %v975_v44  ;;  %346 = vst [vmem:[%s141_s12 + $0x8] sm:$0xff] %v342_v14  ;;  %vm309_vm13 = vcmp.lt.s32.totalorder %v829_v13, %v983_v47 }
  0x6e   : > { %v247_v17 = vor.u32 %v243_v12, %v210_v11  ;;  %v331_v18 = vand.u32 %v328_v59, %v320_v15  ;;  %vm313_vm14 = vmand %vm304_vm9, %vm309_vm13  ;;  %p555_p5 = por %p554_p1, %p553_p13 }
  0x6f   : > { %v317_v21 = vsel %vm313_vm14, 16, %v620_v10 }
  0x70   : > { %v284_v20 = vor.u32 %v280_v16, %v247_v17  ;;  %vm335_vm15 = vcmp.ne.s32.totalorder %v331_v18, 0  ;;  %p556_p7 = pnand %p555_p5, %p549_p4 }
  0x71   : > { %v343_v22 = vsel %vm335_vm15, 0.0, %v339_v19 }
  0x72   : > { %v321_v23 = vor.u32 %v317_v21, %v284_v20  ;;  %347 = vst [vmem:[%s141_s12 + $0x10] sm:$0xff] %v343_v22 }
  0x74   : > { %v332_v24 = vand.u32 %v328_v59, %v321_v23 }
  0x76   : > { %vm336_vm1 = vcmp.ne.s32.totalorder %v332_v24, 0 }
  0x77   : > { %v344_v10 = vsel %vm336_vm1, 0.0, %v340_v25 }
  0x78   : > { %348 = vst [vmem:[%s141_s12 + $0x18] sm:$0xff] %v344_v10 }
  0x79   : > { %559 = shalt.err (!%p556_p7)
}
  0x7a   : > { %s560_s29 = scalar_lea.hbm %s1061_s21, 512  ;;  %s564_s7 = scalar_lea.hbm %s1107_s2, 1024 }
  0x7b   : > { %p561_p9 = scmp.ne.s32.totalorder %s1061_s21, %s560_s29  ;;  %p565_p0 = scmp.lt.u32.totalorder %s1061_s21, %s1107_s2 }
  0x7c   : > { %p566_p6 = scmp.lt.u32.totalorder %s564_s7, %s560_s29  ;;  %p568_p11 = scmp.lt.u32.totalorder %s560_s29, %s1061_s21 }
  0x7d   : > { %p562_p10 = pnand %p561_p9, %p1124_p2 }
  0x7e   : > { %p567_p8 = por %p566_p6, %p565_p0 }
  0x7f   : > { %p563_p12 = pneg %p562_p10 }
  0x80   : > { %p569_p3 = por %p568_p11, %p567_p8 }
  0x82   : > { %p570_p4 = pnand %p569_p3, %p563_p12 }
  0x84   : > { %573 = shalt.err (!%p570_p4)
}
  0x85   : > { %s622_s24 = smov 128   ;;  %s623_s11 = smov 8  }
  0x86   : > { %454 = dma.vmem_to_hbm [thread:$0]  (%p1124_p2), %s1056_s3, 512, %s1061_s21, %s350_s23, %s622_s24, %s622_s24, %s623_s11  }
  0x87 PF: > { %s378_s4 = sand.u32 1, %s602_s14   ;;  %p1125_p13 = scmp.ne.s32.totalorder %s1112_s26, 0 }
  0x88   : > { %p1126_p1 = scmp.ge.s32.totalorder %s614_s16, 2  ;;  %s379_s12 = scalar_lea.sflag [#allocation6], %s378_s4 }
  0x8a   : > { %p461_p5 = pnand %p1126_p1, %p1125_p13 }
  0x8c   : > { %597 = dma.done.wait (!%p461_p5), %s379_s12, 512  }
  0x8d   : > { %599 = vsyncadd (!%p461_p5), %s379_s12, 4294966784  ;;  %p21_p7 = scmp.ge.s32.totalorder %s667_s19, 4   ;;  %s1127_s14 = smov %s606_s0 }
  0x8e   : > { %s1128_s0 = smov %s610_s15  ;;  %s1129_s15 = smov %s679_s22 }
  0x8f   : > { %s1130_s16 = smov %s667_s19  ;;  %23 = sbr.rel (!%p21_p7) target bundleno = 20 (0x14), region = 69 }
  0x96   :  { %384 = vsyncpa [#allocation5], 1 }
  0x97   :  { %386 = vsyncpa [#allocation5 + $0x1], 1 }
  0x98   :  { %387 = vsyncpa [#allocation6], 1 }
  0x99   :  { %389 = vsyncpa [#allocation6 + $0x1], 1 }

</bundles_post_ra>
